<compile_context>
chip_gen: v7x
topology: tpu7x:2x2x1
jax: 0.10.0
libtpu: 0.0.40
codegen_flags: <defaults>
</compile_context>

<pallas_src>
import functools

import jax
import jax.numpy as jnp
from jax.experimental import pallas as pl
from jax.experimental.pallas import tpu as pltpu

X_DIM = 64   # flattened input dimension (e.g. small 8x8 "image")
H_DIM = 32   # hidden dimension
Z_DIM = 5    # logical latent dimension (matches self.z_dim = 5 in the module)
Z_PAD = 8    # latent dimension padded to native 8-sublane granularity


def _round_up(n, m):
    return ((n + m - 1) // m) * m


def _batch_map(i):      # block index along the batch grid axis
    return (i, 0)


def _const_map(i):      # weights / biases: same (whole-array) block every step
    return (0, 0)


def _vae_kernel(sigmoid,
                x_ref, eps_ref,
                w_e_ref, b_e_ref,
                w_ml_ref, b_ml_ref,
                w_d1_ref, b_d1_ref,
                w_d2_ref, b_d2_ref,
                xpred_ref, mulv_ref):
    bf16 = jnp.bfloat16
    x = x_ref[...]

    # ----- encoder -----
    h = jnp.tanh(
        jnp.dot(x.astype(bf16), w_e_ref[...], preferred_element_type=jnp.float32)
        + b_e_ref[...]
    )
    # fused mu/logvar projection -> lane-dense [TB, 2*Z_PAD] slab
    mulv = (
        jnp.dot(h.astype(bf16), w_ml_ref[...], preferred_element_type=jnp.float32)
        + b_ml_ref[...]
    )
    mu = mulv[:, :Z_PAD]
    logvar = mulv[:, Z_PAD:]

    # ----- reparameterization sample: z = mu + eps * exp(0.5 * logvar) -----
    std = jnp.exp(0.5 * logvar)
    z = mu + eps_ref[...] * std          # padded latent cols are exactly zero

    # ----- decoder -----
    hd = jnp.tanh(
        jnp.dot(z.astype(bf16), w_d1_ref[...], preferred_element_type=jnp.float32)
        + b_d1_ref[...]
    )
    logits = (
        jnp.dot(hd.astype(bf16), w_d2_ref[...], preferred_element_type=jnp.float32)
        + b_d2_ref[...]
    )
    if sigmoid:
        logits = jax.nn.sigmoid(logits)

    xpred_ref[...] = logits
    mulv_ref[...] = mulv


def vae_forward(x, eps, packed, *, sigmoid=False, tb=None):
    """Fused VAE forward.

    x: [B, X_DIM] float, eps: [B, Z_DIM] float, packed: packed params (see pack_params).
    Returns (x_pred [B, X_DIM], mu [B, Z_DIM], logvar [B, Z_DIM]) in float32.
    """
    B = x.shape[0]
    if tb is None:
        tb = min(1024, _round_up(max(B, 1), 8))   # amortize per-step overhead at large B
    tb = _round_up(tb, 8)
    b_pad = _round_up(B, tb)
    nb = b_pad // tb

    # Pad batch to a tile multiple and latent noise to the padded latent width.
    x_p = jnp.pad(x.astype(jnp.float32), ((0, b_pad - B), (0, 0)))
    eps_p = jnp.pad(eps.astype(jnp.float32),
                    ((0, b_pad - B), (0, Z_PAD - eps.shape[1])))

    args = (
        x_p, eps_p,
        packed["w_e"], packed["b_e"],
        packed["w_ml"], packed["b_ml"],
        packed["w_d1"], packed["b_d1"],
        packed["w_d2"], packed["b_d2"],
    )

    out_shape = (
        jax.ShapeDtypeStruct((b_pad, X_DIM), jnp.float32),       # x_pred
        jax.ShapeDtypeStruct((b_pad, 2 * Z_PAD), jnp.float32),   # packed mu||logvar slab
    )

    in_specs = [
        pl.BlockSpec((tb, X_DIM), _batch_map),          # x
        pl.BlockSpec((tb, Z_PAD), _batch_map),          # eps
        pl.BlockSpec((X_DIM, H_DIM), _const_map),       # w_e
        pl.BlockSpec((1, H_DIM), _const_map),           # b_e
        pl.BlockSpec((H_DIM, 2 * Z_PAD), _const_map),   # w_ml (mu|logvar fused)
        pl.BlockSpec((1, 2 * Z_PAD), _const_map),       # b_ml
        pl.BlockSpec((Z_PAD, H_DIM), _const_map),       # w_d1
        pl.BlockSpec((1, H_DIM), _const_map),           # b_d1
        pl.BlockSpec((H_DIM, X_DIM), _const_map),       # w_d2
        pl.BlockSpec((1, X_DIM), _const_map),           # b_d2
    ]
    out_specs = (
        pl.BlockSpec((tb, X_DIM), _batch_map),
        pl.BlockSpec((tb, 2 * Z_PAD), _batch_map),
    )

    flops = 2 * b_pad * (X_DIM * H_DIM + H_DIM * 2 * Z_PAD + Z_PAD * H_DIM + H_DIM * X_DIM)
    transcendentals = b_pad * (H_DIM + Z_PAD + H_DIM + (X_DIM if sigmoid else 0))
    bytes_accessed = (
        sum(int(a.size) * a.dtype.itemsize for a in args)
        + b_pad * X_DIM * 4 + b_pad * 2 * Z_PAD * 4
    )

    x_pred_p, mulv_p = pl.pallas_call(
        functools.partial(_vae_kernel, sigmoid),
        grid=(nb,),
        in_specs=in_specs,
        out_specs=out_specs,
        out_shape=out_shape,
        compiler_params=pltpu.CompilerParams(
            dimension_semantics=("parallel",)),
        cost_estimate=pl.CostEstimate(
            flops=int(flops),
            transcendentals=int(transcendentals),
            bytes_accessed=int(bytes_accessed)),
    )(*args)

    x_pred = x_pred_p[:B]
    mu = mulv_p[:B, :Z_DIM]
    logvar = mulv_p[:B, Z_PAD:Z_PAD + Z_DIM]
    return x_pred, mu, logvar


def init_params(key):
    """Deterministic logical params (PyTorch-Linear-like U(-1/sqrt(fan_in), +...) init)."""
    ks = jax.random.split(key, 10)

    def lin(kw, kb, fan_in, fan_out):
        bound = 1.0 / jnp.sqrt(jnp.float32(fan_in))
        w = jax.random.uniform(kw, (fan_in, fan_out), jnp.float32, -bound, bound)
        b = jax.random.uniform(kb, (1, fan_out), jnp.float32, -bound, bound)
        return w, b

    w_e, b_e = lin(ks[0], ks[1], X_DIM, H_DIM)
    w_mu, b_mu = lin(ks[2], ks[3], H_DIM, Z_DIM)
    w_lv, b_lv = lin(ks[4], ks[5], H_DIM, Z_DIM)
    w_d1, b_d1 = lin(ks[6], ks[7], Z_DIM, H_DIM)
    w_d2, b_d2 = lin(ks[8], ks[9], H_DIM, X_DIM)
    return dict(w_e=w_e, b_e=b_e, w_mu=w_mu, b_mu=b_mu, w_lv=w_lv, b_lv=b_lv,
                w_d1=w_d1, b_d1=b_d1, w_d2=w_d2, b_d2=b_d2)


def pack_params(params):
    """Pack logical params into the kernel layout: fused mu|logvar projection,
    latent dim zero-padded 5->8, weights in bf16 (f32 biases)."""
    def pad_cols(a):
        return jnp.pad(a, ((0, 0), (0, Z_PAD - a.shape[1])))

    w_ml = jnp.concatenate([pad_cols(params["w_mu"]), pad_cols(params["w_lv"])], axis=1)
    b_ml = jnp.concatenate([pad_cols(params["b_mu"]), pad_cols(params["b_lv"])], axis=1)
    w_d1 = jnp.pad(params["w_d1"], ((0, Z_PAD - Z_DIM), (0, 0)))

    return dict(
        w_e=params["w_e"].astype(jnp.bfloat16),  b_e=params["b_e"].astype(jnp.float32),
        w_ml=w_ml.astype(jnp.bfloat16),          b_ml=b_ml.astype(jnp.float32),
        w_d1=w_d1.astype(jnp.bfloat16),          b_d1=params["b_d1"].astype(jnp.float32),
        w_d2=params["w_d2"].astype(jnp.bfloat16), b_d2=params["b_d2"].astype(jnp.float32),
    )


def vae_reference(x, eps, params, *, sigmoid=False):
    """Pure-JAX reference with the same bf16-input / f32-accumulate matmuls."""
    bf16 = jnp.bfloat16

    def mm(a, w):
        return jnp.dot(a.astype(bf16), w.astype(bf16), preferred_element_type=jnp.float32)

    h = jnp.tanh(mm(x, params["w_e"]) + params["b_e"])
    mu = mm(h, params["w_mu"]) + params["b_mu"]
    logvar = mm(h, params["w_lv"]) + params["b_lv"]
    z = mu + eps * jnp.exp(0.5 * logvar)
    hd = jnp.tanh(mm(z, params["w_d1"]) + params["b_d1"])
    x_pred = mm(hd, params["w_d2"]) + params["b_d2"]
    if sigmoid:
        x_pred = jax.nn.sigmoid(x_pred)
    return x_pred, mu, logvar


if __name__ == "__main__":
    key = jax.random.PRNGKey(0)
    k_param, k_x, k_eps, k_x2, k_eps2 = jax.random.split(key, 5)

    params = init_params(k_param)
    packed = pack_params(params)

    # --- small demo batch (single tile) ---
    B = 2
    x = jax.random.uniform(k_x, (B, X_DIM), jnp.float32)      # batch of data points
    eps = jax.random.normal(k_eps, (B, Z_DIM), jnp.float32)   # ~ torch.randn_like(std)

    x_pred, mu, logvar = vae_forward(x, eps, packed, sigmoid=False)
    jax.block_until_ready((x_pred, mu, logvar))

    xp_ref, mu_ref, lv_ref = vae_reference(x, eps, params, sigmoid=False)
    assert x_pred.shape == (B, X_DIM) and mu.shape == (B, Z_DIM) and logvar.shape == (B, Z_DIM)
    assert jnp.allclose(x_pred, xp_ref, atol=2e-2, rtol=2e-2), "x_pred mismatch"
    assert jnp.allclose(mu, mu_ref, atol=2e-2, rtol=2e-2), "mu mismatch"
    assert jnp.allclose(logvar, lv_ref, atol=2e-2, rtol=2e-2), "logvar mismatch"

    # --- larger batch: multiple pipelined grid tiles + ragged-remainder padding, sigmoid head ---
    B2 = 300
    x2 = jax.random.uniform(k_x2, (B2, X_DIM), jnp.float32)
    eps2 = jax.random.normal(k_eps2, (B2, Z_DIM), jnp.float32)

    x_pred2, mu2, logvar2 = vae_forward(x2, eps2, packed, sigmoid=True, tb=128)
    jax.block_until_ready((x_pred2, mu2, logvar2))

    xp2_ref, mu2_ref, lv2_ref = vae_reference(x2, eps2, params, sigmoid=True)
    assert x_pred2.shape == (B2, X_DIM) and mu2.shape == (B2, Z_DIM)
    assert jnp.allclose(x_pred2, xp2_ref, atol=2e-2, rtol=2e-2), "x_pred (tiled) mismatch"
    assert jnp.allclose(mu2, mu2_ref, atol=2e-2, rtol=2e-2), "mu (tiled) mismatch"
    assert jnp.allclose(logvar2, lv2_ref, atol=2e-2, rtol=2e-2), "logvar (tiled) mismatch"

    print("KERNEL_OK")
</pallas_src>

<mosaic_0001>
module attributes {stable_mosaic.version = 11 : i64} {
  func.func @_vae_kernel(%arg0: i32, %arg1: memref<8x64xf32, #tpu.memory_space<vmem>>, %arg2: memref<8x8xf32, #tpu.memory_space<vmem>>, %arg3: memref<64x32xbf16, #tpu.memory_space<vmem>>, %arg4: memref<1x32xf32, #tpu.memory_space<vmem>>, %arg5: memref<32x16xbf16, #tpu.memory_space<vmem>>, %arg6: memref<1x16xf32, #tpu.memory_space<vmem>>, %arg7: memref<8x32xbf16, #tpu.memory_space<vmem>>, %arg8: memref<1x32xf32, #tpu.memory_space<vmem>>, %arg9: memref<32x64xbf16, #tpu.memory_space<vmem>>, %arg10: memref<1x64xf32, #tpu.memory_space<vmem>>, %arg11: memref<8x64xf32, #tpu.memory_space<vmem>>, %arg12: memref<8x16xf32, #tpu.memory_space<vmem>>) attributes {dimension_semantics = [#tpu.dimension_semantics<parallel>], iteration_bounds = array<i64: 1>, scalar_prefetch = 0 : i64, scratch_operands = 0 : i64, tpu.core_type = #tpu.core_type<tc>, window_params = [{transform_indices = @transform_0, window_bounds = array<i64: 8, 64>}, {transform_indices = @transform_1, window_bounds = array<i64: 8, 8>}, {pipeline_mode = #tpu.pipeline_mode<synchronous>, transform_indices = @transform_2, window_bounds = array<i64: 64, 32>}, {pipeline_mode = #tpu.pipeline_mode<synchronous>, transform_indices = @transform_3, window_bounds = array<i64: 1, 32>}, {pipeline_mode = #tpu.pipeline_mode<synchronous>, transform_indices = @transform_4, window_bounds = array<i64: 32, 16>}, {pipeline_mode = #tpu.pipeline_mode<synchronous>, transform_indices = @transform_5, window_bounds = array<i64: 1, 16>}, {pipeline_mode = #tpu.pipeline_mode<synchronous>, transform_indices = @transform_6, window_bounds = array<i64: 8, 32>}, {pipeline_mode = #tpu.pipeline_mode<synchronous>, transform_indices = @transform_7, window_bounds = array<i64: 1, 32>}, {pipeline_mode = #tpu.pipeline_mode<synchronous>, transform_indices = @transform_8, window_bounds = array<i64: 32, 64>}, {pipeline_mode = #tpu.pipeline_mode<synchronous>, transform_indices = @transform_9, window_bounds = array<i64: 1, 64>}, {transform_indices = @transform_10, window_bounds = array<i64: 8, 64>}, {transform_indices = @transform_11, window_bounds = array<i64: 8, 16>}]} {
    %c0 = arith.constant 0 : index
    %c0_0 = arith.constant 0 : index
    %0 = vector.load %arg1[%c0, %c0_0] : memref<8x64xf32, #tpu.memory_space<vmem>>, vector<8x64xf32>
    %1 = arith.truncf %0 : vector<8x64xf32> to vector<8x64xbf16>
    %c0_1 = arith.constant 0 : index
    %c0_2 = arith.constant 0 : index
    %2 = vector.load %arg3[%c0_1, %c0_2] : memref<64x32xbf16, #tpu.memory_space<vmem>>, vector<64x32xbf16>
    %cst = arith.constant dense<0.000000e+00> : vector<8x32xf32>
    %3 = tpu.matmul %1, %2, %cst {dimension_numbers = #tpu.dot_dimension_numbers<[1], [0], [0], [1], [0, 0, 1, 1], [], []>} : vector<8x64xbf16>, vector<64x32xbf16>, vector<8x32xf32> -> vector<8x32xf32>
    %c0_3 = arith.constant 0 : index
    %c0_4 = arith.constant 0 : index
    %4 = vector.load %arg4[%c0_3, %c0_4] : memref<1x32xf32, #tpu.memory_space<vmem>>, vector<1x32xf32>
    %5 = vector.broadcast %4 : vector<1x32xf32> to vector<8x32xf32>
    %6 = arith.addf %3, %5 : vector<8x32xf32>
    %7 = math.tanh %6 : vector<8x32xf32>
    %8 = arith.truncf %7 : vector<8x32xf32> to vector<8x32xbf16>
    %c0_5 = arith.constant 0 : index
    %c0_6 = arith.constant 0 : index
    %9 = vector.load %arg5[%c0_5, %c0_6] : memref<32x16xbf16, #tpu.memory_space<vmem>>, vector<32x16xbf16>
    %cst_7 = arith.constant dense<0.000000e+00> : vector<8x16xf32>
    %10 = tpu.matmul %8, %9, %cst_7 {dimension_numbers = #tpu.dot_dimension_numbers<[1], [0], [0], [1], [0, 0, 1, 1], [], []>} : vector<8x32xbf16>, vector<32x16xbf16>, vector<8x16xf32> -> vector<8x16xf32>
    %c0_8 = arith.constant 0 : index
    %c0_9 = arith.constant 0 : index
    %11 = vector.load %arg6[%c0_8, %c0_9] : memref<1x16xf32, #tpu.memory_space<vmem>>, vector<1x16xf32>
    %12 = vector.broadcast %11 : vector<1x16xf32> to vector<8x16xf32>
    %13 = arith.addf %10, %12 : vector<8x16xf32>
    %14 = vector.extract_strided_slice %13 {offsets = [0, 0], sizes = [8, 8], strides = [1, 1]} : vector<8x16xf32> to vector<8x8xf32>
    %15 = vector.extract_strided_slice %13 {offsets = [0, 8], sizes = [8, 8], strides = [1, 1]} : vector<8x16xf32> to vector<8x8xf32>
    %cst_10 = arith.constant 5.000000e-01 : f32
    %16 = vector.broadcast %cst_10 : f32 to vector<8x8xf32>
    %17 = arith.mulf %16, %15 : vector<8x8xf32>
    %18 = math.exp %17 : vector<8x8xf32>
    %c0_11 = arith.constant 0 : index
    %c0_12 = arith.constant 0 : index
    %19 = vector.load %arg2[%c0_11, %c0_12] : memref<8x8xf32, #tpu.memory_space<vmem>>, vector<8x8xf32>
    %20 = arith.mulf %19, %18 : vector<8x8xf32>
    %21 = arith.addf %14, %20 : vector<8x8xf32>
    %22 = arith.truncf %21 : vector<8x8xf32> to vector<8x8xbf16>
    %c0_13 = arith.constant 0 : index
    %c0_14 = arith.constant 0 : index
    %23 = vector.load %arg7[%c0_13, %c0_14] : memref<8x32xbf16, #tpu.memory_space<vmem>>, vector<8x32xbf16>
    %cst_15 = arith.constant dense<0.000000e+00> : vector<8x32xf32>
    %24 = tpu.matmul %22, %23, %cst_15 {dimension_numbers = #tpu.dot_dimension_numbers<[1], [0], [0], [1], [0, 0, 1, 1], [], []>} : vector<8x8xbf16>, vector<8x32xbf16>, vector<8x32xf32> -> vector<8x32xf32>
    %c0_16 = arith.constant 0 : index
    %c0_17 = arith.constant 0 : index
    %25 = vector.load %arg8[%c0_16, %c0_17] : memref<1x32xf32, #tpu.memory_space<vmem>>, vector<1x32xf32>
    %26 = vector.broadcast %25 : vector<1x32xf32> to vector<8x32xf32>
    %27 = arith.addf %24, %26 : vector<8x32xf32>
    %28 = math.tanh %27 : vector<8x32xf32>
    %29 = arith.truncf %28 : vector<8x32xf32> to vector<8x32xbf16>
    %c0_18 = arith.constant 0 : index
    %c0_19 = arith.constant 0 : index
    %30 = vector.load %arg9[%c0_18, %c0_19] : memref<32x64xbf16, #tpu.memory_space<vmem>>, vector<32x64xbf16>
    %cst_20 = arith.constant dense<0.000000e+00> : vector<8x64xf32>
    %31 = tpu.matmul %29, %30, %cst_20 {dimension_numbers = #tpu.dot_dimension_numbers<[1], [0], [0], [1], [0, 0, 1, 1], [], []>} : vector<8x32xbf16>, vector<32x64xbf16>, vector<8x64xf32> -> vector<8x64xf32>
    %c0_21 = arith.constant 0 : index
    %c0_22 = arith.constant 0 : index
    %32 = vector.load %arg10[%c0_21, %c0_22] : memref<1x64xf32, #tpu.memory_space<vmem>>, vector<1x64xf32>
    %33 = vector.broadcast %32 : vector<1x64xf32> to vector<8x64xf32>
    %34 = arith.addf %31, %33 : vector<8x64xf32>
    %c0_23 = arith.constant 0 : index
    %c0_24 = arith.constant 0 : index
    %35 = vector.load %arg11[%c0_23, %c0_24] : memref<8x64xf32, #tpu.memory_space<vmem>>, vector<8x64xf32>
    tpu.vector_store %arg11[%c0_23, %c0_24], %34 {strides = array<i32>} : memref<8x64xf32, #tpu.memory_space<vmem>>, vector<8x64xf32>,
    %c0_25 = arith.constant 0 : index
    %c0_26 = arith.constant 0 : index
    %36 = vector.load %arg12[%c0_25, %c0_26] : memref<8x16xf32, #tpu.memory_space<vmem>>, vector<8x16xf32>
    tpu.vector_store %arg12[%c0_25, %c0_26], %13 {strides = array<i32>} : memref<8x16xf32, #tpu.memory_space<vmem>>, vector<8x16xf32>,
    return
  }
  func.func @transform_0(%arg0: i32) -> (i32, i32) {
    %c0_i32 = arith.constant 0 : i32
    %c0_i32_0 = arith.constant 0 : i32
    return %arg0, %c0_i32 : i32, i32
  }
  func.func @transform_1(%arg0: i32) -> (i32, i32) {
    %c0_i32 = arith.constant 0 : i32
    %c0_i32_0 = arith.constant 0 : i32
    return %arg0, %c0_i32 : i32, i32
  }
  func.func @transform_2(%arg0: i32) -> (i32, i32) {
    %c0_i32 = arith.constant 0 : i32
    %c0_i32_0 = arith.constant 0 : i32
    %c0_i32_1 = arith.constant 0 : i32
    return %c0_i32, %c0_i32_0 : i32, i32
  }
  func.func @transform_3(%arg0: i32) -> (i32, i32) {
    %c0_i32 = arith.constant 0 : i32
    %c0_i32_0 = arith.constant 0 : i32
    %c0_i32_1 = arith.constant 0 : i32
    return %c0_i32, %c0_i32_0 : i32, i32
  }
  func.func @transform_4(%arg0: i32) -> (i32, i32) {
    %c0_i32 = arith.constant 0 : i32
    %c0_i32_0 = arith.constant 0 : i32
    %c0_i32_1 = arith.constant 0 : i32
    return %c0_i32, %c0_i32_0 : i32, i32
  }
  func.func @transform_5(%arg0: i32) -> (i32, i32) {
    %c0_i32 = arith.constant 0 : i32
    %c0_i32_0 = arith.constant 0 : i32
    %c0_i32_1 = arith.constant 0 : i32
    return %c0_i32, %c0_i32_0 : i32, i32
  }
  func.func @transform_6(%arg0: i32) -> (i32, i32) {
    %c0_i32 = arith.constant 0 : i32
    %c0_i32_0 = arith.constant 0 : i32
    %c0_i32_1 = arith.constant 0 : i32
    return %c0_i32, %c0_i32_0 : i32, i32
  }
  func.func @transform_7(%arg0: i32) -> (i32, i32) {
    %c0_i32 = arith.constant 0 : i32
    %c0_i32_0 = arith.constant 0 : i32
    %c0_i32_1 = arith.constant 0 : i32
    return %c0_i32, %c0_i32_0 : i32, i32
  }
  func.func @transform_8(%arg0: i32) -> (i32, i32) {
    %c0_i32 = arith.constant 0 : i32
    %c0_i32_0 = arith.constant 0 : i32
    %c0_i32_1 = arith.constant 0 : i32
    return %c0_i32, %c0_i32_0 : i32, i32
  }
  func.func @transform_9(%arg0: i32) -> (i32, i32) {
    %c0_i32 = arith.constant 0 : i32
    %c0_i32_0 = arith.constant 0 : i32
    %c0_i32_1 = arith.constant 0 : i32
    return %c0_i32, %c0_i32_0 : i32, i32
  }
  func.func @transform_10(%arg0: i32) -> (i32, i32) {
    %c0_i32 = arith.constant 0 : i32
    %c0_i32_0 = arith.constant 0 : i32
    return %arg0, %c0_i32 : i32, i32
  }
  func.func @transform_11(%arg0: i32) -> (i32, i32) {
    %c0_i32 = arith.constant 0 : i32
    %c0_i32_0 = arith.constant 0 : i32
    return %arg0, %c0_i32 : i32, i32
  }
}

</mosaic_0001>

<bundles_post_ra>
// kernel: tpu_custom_call.1
= control target key start
LH: loop header
LB: loop body
LE: loop exit
PB: predicated region body
PF: predicated region fallthrough
CT: control target
= control target key end

     0   :  { %17 = vsyncpa [#allocation3], 0  ;;  %v490_v1 = vmov 0.0   ;;  %vm491_vm0 = vmmov 0   ;;  %s645_s0 = inlined_call_operand.vmem [shape: f32[8,64], index: 0, kind: input, shape index: {}]   ;;  %s646_s1 = inlined_call_operand.vmem [shape: f32[8,8], index: 1, kind: input, shape index: {}]   ;;  %s647_s2 = inlined_call_operand.vmem [shape: bf16[64,32], index: 2, kind: input, shape index: {}]   ;;  %s648_s3 = inlined_call_operand.vmem [shape: f32[1,32], index: 3, kind: input, shape index: {}]   ;;  %s649_s4 = inlined_call_operand.vmem [shape: bf16[32,16], index: 4, kind: input, shape index: {}]   ;;  %s650_s5 = inlined_call_operand.vmem [shape: f32[1,16], index: 5, kind: input, shape index: {}]   ;;  %s651_s6 = inlined_call_operand.vmem [shape: bf16[8,32], index: 6, kind: input, shape index: {}]   ;;  %s652_s7 = inlined_call_operand.vmem [shape: f32[1,32], index: 7, kind: input, shape index: {}]   ;;  %s653_s8 = inlined_call_operand.vmem [shape: bf16[32,64], index: 8, kind: input, shape index: {}]   ;;  %s654_s9 = inlined_call_operand.vmem [shape: f32[1,64], index: 9, kind: input, shape index: {}]   ;;  %s655_s10 = inlined_call_operand.hbm [shape: f32[8,64], index: 10, kind: output, shape index: {0}]   ;;  %s656_s11 = inlined_call_operand.hbm [shape: f32[8,16], index: 11, kind: output, shape index: {1}]  }
   0x1   :  { %v428_v0 = vld [vmem:[%s647_s2] sm:$0xff]   ;;  %389 = vmatprep.subr.bf16.mxu0 %v490_v1  ;;  %401 = vmatprep.subr.bf16.mxu1 %v490_v1  ;;  %v429_v2 = vld [vmem:[%s647_s2 + $0x8] sm:$0xff]   ;;  %v430_v3 = vld [vmem:[%s647_s2 + $0x10] sm:$0xff]  }
   0x2   :  { %390 = vmatpush3.bf16.msra.mxu0 %v428_v0  ;;  %397 = vmatprep.mubr.msk.bf16.mxu0 %vm491_vm0, %v490_v1 }
   0x3   :  { %391 = vmatprep.subr.bf16.mxu0 %v490_v1  ;;  %405 = vmatprep.mubr.msk.bf16.mxu1 %vm491_vm0, %v490_v1 }
   0x6   :  { %392 = vmatpush3.bf16.msra.mxu0 %v429_v2 }
   0x7   :  { %393 = vmatprep.subr.bf16.mxu0 %v490_v1 }
   0x8   :  { %18 = vsyncpa [#allocation5], 0  ;;  %v431_v4 = vld [vmem:[%s647_s2 + $0x18] sm:$0xff]   ;;  %v40_v5 = vld [vmem:[%s645_s0] sm:$0xff]  ;;  %vm81_vm1 = vcmask 523264   ;;  %vm150_vm2 = vcmask 261120  }
   0x9   :  { %v41_v6 = vpack.c.bf16 %v40_v5, %v40_v5  ;;  %v432_v7 = vld [vmem:[%s649_s4] sm:$0xff]   ;;  %v433_v8 = vld [vmem:[%s649_s4 + $0x8] sm:$0xff]   ;;  %vm217_vm3 = vcmask 1043456   ;;  %vm330_vm4 = vcmask 130048   ;;  %s492_s14 = smov 120   ;;  %vm213_vm5 = vcmask 64512  }
   0xa   :  { %394 = vmatpush3.bf16.msra.mxu0 %v430_v3  ;;  %402 = vmatpush3.bf16.msra.mxu1 %v432_v7  ;;  %v360_v9 = vld [vmem:[%s648_s3] ss:$0 sm:$0xff]  ;;  %v435_v34 = vld [vmem:[%s653_s8 + $0x8] sm:$0xff]   ;;  %s493_s20 = smov [#allocation4]  }
   0xb   :  { %395 = vmatprep.subr.bf16.mxu0 %v490_v1  ;;  %403 = vmatprep.subr.bf16.mxu1 %v490_v1  ;;  %v205_v17 = vld [vmem:[%s651_s6] sm:$0xf]  ;;  %s348_s21 = sshll.u32 %s493_s20, 4  ;;  %s349_s21 = int_to_ptr.vmem [resolvable:$true] %s348_s21 }
   0xc   :  { %v219_v18 = vsel %vm217_vm3, %v205_v17, 0  ;;  %v366_v19 = vld [vmem:[%s650_s5] ss:$0 sm:$0xff]  ;;  %s442_s22 = scalar_lea.vmem %s349_s21, 128  ;;  %p447_p1 = scmp.lt.s32.totalorder %s349_s21, %s349_s21 }
   0xd   :  { %v197_v28 = vld [vmem:[%s646_s1] sm:$0xff]  ;;  %p443_p0 = scmp.ne.s32.totalorder %s349_s21, %s442_s22  ;;  %p448_p2 = scmp.lt.s32.totalorder %s442_s22, %s442_s22 }
   0xe   :  { %396 = vmatpush3.bf16.msra.mxu0 %v431_v4  ;;  %404 = vmatpush3.bf16.msra.mxu1 %v433_v8  ;;  %v434_v33 = vld [vmem:[%s653_s8] sm:$0xff]  }
   0xf   :  { %415 = vmatprep.subr.bf16.mxu0 %v490_v1  ;;  %409 = vmatprep.subr.bf16.mxu1 %v490_v1  ;;  %v370_v35 = vld [vmem:[%s652_s7] ss:$0 sm:$0xff]  ;;  %p449_p3 = por %p448_p2, %p447_p1 }
  0x11   :  { %398 = vmatmul.mubr.msk.bf16.vlgmr.msra.gmra.mrb[0].mxu0 %vm81_vm1, %v41_v6  ;;  %p450_p4 = pnand %p449_p3, %p443_p0 }
  0x12   :  { %419 = vmatprep.mubr.msk.bf16.mxu0 %vm491_vm0, %v490_v1  ;;  %416 = vmatpush3.bf16.msra.mxu0 %v434_v33 }
  0x13   :  { %417 = vmatprep.subr.bf16.mxu0 %v490_v1 }
  0x16   :  { %418 = vmatpush3.bf16.msra.mxu0 %v435_v34 }
  0xe4   :  { %v119_v10 = vpop.f32.mrb[0].mxu0 }
  0xe5   :  { %v120_v11 = vadd.f32 %v360_v9, %v119_v10  ;;  %v399_v12 = vpop.f32.mrb[1].mxu0 }
  0xe6   :  { %v122_v13 = vpop.f32.mrb[2].mxu0 }
  0xe7   :  { %436 = vtanh.f32 %v120_v11  ;;  %v400_v14 = vpop.f32.mrb[3].mxu0 }
  0xf1   :  { %v437_v15 = vpop.eup %436 }
  0xf2   :  { %v126_v16 = vpack.c.bf16 %v437_v15, %v437_v15 }
  0xf4   :  { %406 = vmatmul.mubr.msk.bf16.vlgmr.msra.gmra.mrb[0].mxu1 %vm150_vm2, %v126_v16 }
  0xf5   :  { %411 = vmatprep.mubr.msk.bf16.mxu1 %vm491_vm0, %v490_v1  ;;  %410 = vmatpush3.bf16.msra.mxu1 %v219_v18 }
 0x1c7   :  { %v188_v20 = vpop.f32.mrb[0].mxu1 }
 0x1c8   :  { %v189_v21 = vadd.f32 %v366_v19, %v188_v20  ;;  %v407_v22 = vpop.f32.mrb[1].mxu1 }
 0x1c9   :  { %v191_v23 = vpop.f32.mrb[2].mxu1 }
 0x1ca   :  { %v194_v24 = vmul.f32 0.5, %v189_v21  ;;  %v408_v25 = vpop.f32.mrb[3].mxu1  ;;  %331 = vst.msk [vmem:[#allocation4] sm:$0xff] %vm330_vm4, %v189_v21 }
 0x1cc   :  { %v195_v26 = vmul.f32 1.442695, %v194_v24 }
 0x1ce   :  { %438 = vpow2.f32 %v195_v26 }
 0x1d8   :  { %v439_v27 = vpop.eup %438 }
 0x1d9   :  { %199 = vrot.lane.b32.xlu0 %v439_v27, %s492_s14 }
 0x24b   :  { %v200_v29 = vpop.permute.xlu0 %199 }
 0x24c   :  { %v202_v30 = vmul.f32 %v200_v29, %v197_v28 }
 0x24e   :  { %v203_v31 = vadd.f32 %v202_v30, %v189_v21 }
 0x250   :  { %v204_v32 = vpack.c.bf16 %v203_v31, %v203_v31 }
 0x252   :  { %412 = vmatmul.mubr.msk.bf16.vlgmr.msra.gmra.mrb[4].mxu1 %vm213_vm5, %v204_v32 }
 0x325   :  { %v255_v36 = vpop.f32.mrb[4].mxu1 }
 0x326   :  { %v256_v37 = vadd.f32 %v370_v35, %v255_v36  ;;  %v413_v38 = vpop.f32.mrb[5].mxu1 }
 0x327   :  { %v258_v39 = vpop.f32.mrb[6].mxu1 }
 0x328   :  { %440 = vtanh.f32 %v256_v37  ;;  %v414_v40 = vpop.f32.mrb[7].mxu1 }
 0x332   :  { %v441_v41 = vpop.eup %440 }
 0x333   :  { %v262_v42 = vpack.c.bf16 %v441_v41, %v441_v41 }
 0x335   :  { %420 = vmatmul.mubr.msk.bf16.vlgmr.msra.gmra.mrb[4].mxu0 %vm150_vm2, %v262_v42 }
 0x336   :  { %453 = shalt.err (!%p450_p4)
}
 0x337   :  { %s454_s23 = scalar_lea.hbm %s656_s11, 128 }
 0x338   :  { %p455_p5 = scmp.ne.s32.totalorder %s656_s11, %s454_s23  ;;  %p458_p6 = scmp.lt.u32.totalorder %s454_s23, %s656_s11 }
 0x33a   :  { %p460_p7 = pnand %p458_p6, %p455_p5 }
 0x33c   :  { %463 = shalt.err (!%p460_p7)
}
 0x33d   :  { %351 = dma.vmem_to_hbm [thread:$0]  %s349_s21, 128, %s656_s11, [#allocation5]   ;;  %v372_v43 = vld [vmem:[%s654_s9] ss:$0 sm:$0xff] }
 0x33e   :  { %s494_s30 = smov [#allocation2]  }
 0x33f   :  { %s338_s4 = sshll.u32 %s494_s30, 4  ;;  %s339_s4 = int_to_ptr.vmem [resolvable:$true] %s338_s4 }
 0x340   :  { %s464_s12 = scalar_lea.vmem %s339_s4, 128  ;;  %p469_p9 = scmp.lt.s32.totalorder %s339_s4, %s339_s4 }
 0x341   :  { %p465_p8 = scmp.ne.s32.totalorder %s339_s4, %s464_s12  ;;  %p470_p10 = scmp.lt.s32.totalorder %s464_s12, %s464_s12 }
 0x343   :  { %p471_p11 = por %p470_p10, %p469_p9 }
 0x345   :  { %p472_p12 = pnand %p471_p11, %p465_p8 }
 0x408   :  { %v323_v44 = vpop.f32.mrb[4].mxu0 }
 0x409   :  { %v324_v45 = vadd.f32 %v372_v43, %v323_v44  ;;  %v421_v46 = vpop.f32.mrb[5].mxu0 }
 0x40a   :  { %v326_v47 = vpop.f32.mrb[6].mxu0 }
 0x40b   :  { %329 = vst.msk [vmem:[#allocation2] sm:$0xff] %vm81_vm1, %v324_v45  ;;  %v422_v48 = vpop.f32.mrb[7].mxu0 }
 0x40c   :  { %475 = shalt.err (!%p472_p12)
}
 0x40d   :  { %s476_s9 = scalar_lea.hbm %s655_s10, 128 }
 0x40e   :  { %p477_p13 = scmp.ne.s32.totalorder %s655_s10, %s476_s9  ;;  %p480_p0 = scmp.lt.u32.totalorder %s476_s9, %s655_s10 }
 0x410   :  { %p482_p1 = pnand %p480_p0, %p477_p13 }
 0x412   :  { %485 = shalt.err (!%p482_p1)
}
 0x413   :  { %341 = dma.vmem_to_hbm [thread:$0]  %s339_s4, 128, %s655_s10, [#allocation3]  }
 0x414   :  { %486 = dma.done.wait [#allocation3], 128  }
 0x415   :  { %487 = vsyncadd [#allocation3], 4294967168 }
 0x416   :  { %488 = dma.done.wait [#allocation5], 128  }
 0x417   :  { %489 = vsyncadd [#allocation5], 4294967168 }
 0x418   :  { %358 = vsyncpa [#allocation3], 1 }
 0x419   :  { %359 = vsyncpa [#allocation5], 1 }

</bundles_post_ra>
